<compile_context>
chip_gen: v7x
topology: tpu7x:2x2x1
jax: 0.10.0
libtpu: 0.0.40
codegen_flags: <defaults>
</compile_context>

<pallas_src>
import jax
import jax.numpy as jnp
from jax import lax
from jax.experimental import pallas as pl
from jax.experimental.pallas import tpu as pltpu


def _round_up(x: int, m: int) -> int:
    return (x + m - 1) // m * m


def conv_act_lin_kernel(x_ref, wc_ref, bc_ref, wl_ref, bl_ref, o_ref):
    # Contract on dim 1 of both operands: x(tn, C_in) . w_conv(C_out, C_in) -> (tn, C_out)
    dn = (((1,), (1,)), ((), ()))
    h = lax.dot_general(x_ref[...], wc_ref[...], dn,
                        preferred_element_type=jnp.float32)
    h = jnp.maximum(h + bc_ref[...], 0.0)          # conv bias + ReLU (f32 epilogue)
    # h(tn, C_out) . w_lin(NCLS, C_out) -> (tn, NCLS)
    out = lax.dot_general(h, wl_ref[...], dn,
                          preferred_element_type=jnp.float32)
    o_ref[...] = (out + bl_ref[...]).astype(o_ref.dtype)


def conv_act_lin(x, w_conv, b_conv, w_lin, b_lin, *, tile_n: int = 1024):
    """x: (N, C_in). w_conv: (C_out, C_in, 1, 1). Returns (N, num_classes) float32."""
    n, c_in = x.shape
    c_out = w_conv.shape[0]
    ncls = w_lin.shape[0]

    f32 = jnp.float32
    x = x.astype(f32)
    wc = w_conv.reshape(c_out, c_in).astype(f32)   # 1x1 conv == channel matmul
    bc = b_conv.reshape(1, c_out).astype(f32)
    wl = w_lin.astype(f32)                         # (NCLS, C_out), original layout
    bl = b_lin.reshape(1, ncls).astype(f32)

    # Row tile: for n <= 8 a single full-array block (legal even if not /8);
    # otherwise split ~2-way (multiple of 8 sublanes) so v7x's two TCs both get
    # grid steps, capped at tile_n. Trailing partial blocks are masked by Pallas.
    if n <= 8:
        tn = n
    else:
        tn = min(tile_n, _round_up(pl.cdiv(n, 2), 8))
    grid = (pl.cdiv(n, tn),)

    return pl.pallas_call(
        conv_act_lin_kernel,
        out_shape=jax.ShapeDtypeStruct((n, ncls), f32),
        grid_spec=pltpu.PrefetchScalarGridSpec(
            num_scalar_prefetch=0,
            grid=grid,
            in_specs=[
                pl.BlockSpec((tn, c_in), lambda i: (i, 0)),      # x rows, pipelined
                pl.BlockSpec((c_out, c_in), lambda i: (0, 0)),   # conv weight, resident
                pl.BlockSpec((1, c_out), lambda i: (0, 0)),      # conv bias, resident
                pl.BlockSpec((ncls, c_out), lambda i: (0, 0)),   # linear weight, resident
                pl.BlockSpec((1, ncls), lambda i: (0, 0)),       # linear bias, resident
            ],
            out_specs=pl.BlockSpec((tn, ncls), lambda i: (i, 0)),  # real-width store
        ),
        compiler_params=pltpu.CompilerParams(
            dimension_semantics=("parallel",)),   # shard row tiles across TCs on v7x
    )(x, wc, bc, wl, bl)


if __name__ == "__main__":
    # Small shapes consistent with the module's forward.
    batch = 8
    in_channels_2d = 16
    out_channels_2d = 32
    num_classes = 10

    key = jax.random.PRNGKey(0)
    kx, kwc, kbc, kwl, kbl = jax.random.split(key, 5)

    # PyTorch-style uniform(-1/sqrt(fan_in), 1/sqrt(fan_in)) init.
    conv_bound = 1.0 / jnp.sqrt(jnp.float32(in_channels_2d * 1 * 1))
    lin_bound = 1.0 / jnp.sqrt(jnp.float32(out_channels_2d))

    x = jax.random.normal(kx, (batch, in_channels_2d), dtype=jnp.float32)
    w_conv = jax.random.uniform(
        kwc, (out_channels_2d, in_channels_2d, 1, 1),
        minval=-conv_bound, maxval=conv_bound, dtype=jnp.float32)
    b_conv = jax.random.uniform(
        kbc, (out_channels_2d,), minval=-conv_bound, maxval=conv_bound,
        dtype=jnp.float32)
    w_lin = jax.random.uniform(
        kwl, (num_classes, out_channels_2d),
        minval=-lin_bound, maxval=lin_bound, dtype=jnp.float32)
    b_lin = jax.random.uniform(
        kbl, (num_classes,), minval=-lin_bound, maxval=lin_bound,
        dtype=jnp.float32)

    out = conv_act_lin(x, w_conv, b_conv, w_lin, b_lin)
    out = jax.block_until_ready(out)

    # Plain-JAX reference (same math as the PyTorch module).
    h_ref = jnp.maximum(
        x @ w_conv.reshape(out_channels_2d, in_channels_2d).T + b_conv, 0.0)
    ref = h_ref @ w_lin.T + b_lin

    assert out.shape == (batch, num_classes), out.shape
    assert jnp.allclose(out, ref, atol=1e-5, rtol=1e-5), "mismatch vs reference"
    print("KERNEL_OK")
</pallas_src>

<mosaic_0001>
module attributes {stable_mosaic.version = 11 : i64} {
  func.func @conv_act_lin_kernel(%arg0: i32, %arg1: memref<8x16xf32, #tpu.memory_space<vmem>>, %arg2: memref<32x16xf32, #tpu.memory_space<vmem>>, %arg3: memref<1x32xf32, #tpu.memory_space<vmem>>, %arg4: memref<10x32xf32, #tpu.memory_space<vmem>>, %arg5: memref<1x10xf32, #tpu.memory_space<vmem>>, %arg6: memref<8x10xf32, #tpu.memory_space<vmem>>) attributes {dimension_semantics = [#tpu.dimension_semantics<parallel>], iteration_bounds = array<i64: 1>, scalar_prefetch = 0 : i64, scratch_operands = 0 : i64, tpu.core_type = #tpu.core_type<tc>, window_params = [{transform_indices = @transform_0, window_bounds = array<i64: 8, 16>}, {pipeline_mode = #tpu.pipeline_mode<synchronous>, transform_indices = @transform_1, window_bounds = array<i64: 32, 16>}, {pipeline_mode = #tpu.pipeline_mode<synchronous>, transform_indices = @transform_2, window_bounds = array<i64: 1, 32>}, {pipeline_mode = #tpu.pipeline_mode<synchronous>, transform_indices = @transform_3, window_bounds = array<i64: 10, 32>}, {pipeline_mode = #tpu.pipeline_mode<synchronous>, transform_indices = @transform_4, window_bounds = array<i64: 1, 10>}, {transform_indices = @transform_5, window_bounds = array<i64: 8, 10>}]} {
    %c0 = arith.constant 0 : index
    %c0_0 = arith.constant 0 : index
    %0 = vector.load %arg1[%c0, %c0_0] : memref<8x16xf32, #tpu.memory_space<vmem>>, vector<8x16xf32>
    %c0_1 = arith.constant 0 : index
    %c0_2 = arith.constant 0 : index
    %1 = vector.load %arg2[%c0_1, %c0_2] : memref<32x16xf32, #tpu.memory_space<vmem>>, vector<32x16xf32>
    %cst = arith.constant dense<0.000000e+00> : vector<8x32xf32>
    %2 = tpu.matmul %0, %1, %cst {dimension_numbers = #tpu.dot_dimension_numbers<[1], [1], [0], [0], [0, 0, 1, 0], [], []>} : vector<8x16xf32>, vector<32x16xf32>, vector<8x32xf32> -> vector<8x32xf32>
    %c0_3 = arith.constant 0 : index
    %c0_4 = arith.constant 0 : index
    %3 = vector.load %arg3[%c0_3, %c0_4] : memref<1x32xf32, #tpu.memory_space<vmem>>, vector<1x32xf32>
    %4 = vector.broadcast %3 : vector<1x32xf32> to vector<8x32xf32>
    %5 = arith.addf %2, %4 : vector<8x32xf32>
    %cst_5 = arith.constant 0.000000e+00 : f32
    %6 = vector.broadcast %cst_5 : f32 to vector<8x32xf32>
    %7 = arith.maximumf %5, %6 : vector<8x32xf32>
    %c0_6 = arith.constant 0 : index
    %c0_7 = arith.constant 0 : index
    %8 = vector.load %arg4[%c0_6, %c0_7] : memref<10x32xf32, #tpu.memory_space<vmem>>, vector<10x32xf32>
    %cst_8 = arith.constant dense<0.000000e+00> : vector<8x10xf32>
    %9 = tpu.matmul %7, %8, %cst_8 {dimension_numbers = #tpu.dot_dimension_numbers<[1], [1], [0], [0], [0, 0, 1, 0], [], []>} : vector<8x32xf32>, vector<10x32xf32>, vector<8x10xf32> -> vector<8x10xf32>
    %c0_9 = arith.constant 0 : index
    %c0_10 = arith.constant 0 : index
    %10 = vector.load %arg5[%c0_9, %c0_10] : memref<1x10xf32, #tpu.memory_space<vmem>>, vector<1x10xf32>
    %11 = vector.broadcast %10 : vector<1x10xf32> to vector<8x10xf32>
    %12 = arith.addf %9, %11 : vector<8x10xf32>
    %c0_11 = arith.constant 0 : index
    %c0_12 = arith.constant 0 : index
    %13 = vector.load %arg6[%c0_11, %c0_12] : memref<8x10xf32, #tpu.memory_space<vmem>>, vector<8x10xf32>
    tpu.vector_store %arg6[%c0_11, %c0_12], %12 {strides = array<i32>} : memref<8x10xf32, #tpu.memory_space<vmem>>, vector<8x10xf32>,
    return
  }
  func.func @transform_0(%arg0: i32) -> (i32, i32) {
    %c0_i32 = arith.constant 0 : i32
    %c0_i32_0 = arith.constant 0 : i32
    return %arg0, %c0_i32 : i32, i32
  }
  func.func @transform_1(%arg0: i32) -> (i32, i32) {
    %c0_i32 = arith.constant 0 : i32
    %c0_i32_0 = arith.constant 0 : i32
    %c0_i32_1 = arith.constant 0 : i32
    return %c0_i32, %c0_i32_0 : i32, i32
  }
  func.func @transform_2(%arg0: i32) -> (i32, i32) {
    %c0_i32 = arith.constant 0 : i32
    %c0_i32_0 = arith.constant 0 : i32
    %c0_i32_1 = arith.constant 0 : i32
    return %c0_i32, %c0_i32_0 : i32, i32
  }
  func.func @transform_3(%arg0: i32) -> (i32, i32) {
    %c0_i32 = arith.constant 0 : i32
    %c0_i32_0 = arith.constant 0 : i32
    %c0_i32_1 = arith.constant 0 : i32
    return %c0_i32, %c0_i32_0 : i32, i32
  }
  func.func @transform_4(%arg0: i32) -> (i32, i32) {
    %c0_i32 = arith.constant 0 : i32
    %c0_i32_0 = arith.constant 0 : i32
    %c0_i32_1 = arith.constant 0 : i32
    return %c0_i32, %c0_i32_0 : i32, i32
  }
  func.func @transform_5(%arg0: i32) -> (i32, i32) {
    %c0_i32 = arith.constant 0 : i32
    %c0_i32_0 = arith.constant 0 : i32
    return %arg0, %c0_i32 : i32, i32
  }
}

</mosaic_0001>

<bundles_post_ra>
// kernel: tpu_custom_call.1
= control target key start
LH: loop header
LB: loop body
LE: loop exit
PB: predicated region body
PF: predicated region fallthrough
CT: control target
= control target key end

     0   :  { %vm33_vm0 = vcmask 130048   ;;  %v301_v2 = vmov 0.0|0.0   ;;  %vm129_vm2 = vcmask 261120   ;;  %vm302_vm3 = vmmov 0   ;;  %s388_s0 = inlined_call_operand.vmem [shape: f32[8,16], index: 0, kind: input, shape index: {}]   ;;  %s389_s1 = inlined_call_operand.vmem [shape: f32[32,16], index: 1, kind: input, shape index: {}]   ;;  %s390_s2 = inlined_call_operand.vmem [shape: f32[1,32], index: 2, kind: input, shape index: {}]   ;;  %s391_s3 = inlined_call_operand.vmem [shape: f32[10,32], index: 3, kind: input, shape index: {}]   ;;  %s392_s4 = inlined_call_operand.vmem [shape: f32[1,10], index: 4, kind: input, shape index: {}]   ;;  %s393_s5 = inlined_call_operand.hbm [shape: f32[8,10], index: 5, kind: output, shape index: {}]  }
   0x1   :  { %v22_v0 = vld [vmem:[%s389_s1] sm:$0xff]  ;;  %v23_v1 = vld [vmem:[%s389_s1 + $0x8] sm:$0xff]  ;;  %261 = vmatprep.subr.bf16.mxu0 %v301_v2  ;;  %vm343_vm1 = vmpackc.low %vm33_vm0, %vm33_vm0  ;;  %269 = vmatprep.subr.bf16.mxu1 %v301_v2  ;;  %v303_v5 = vmov 0.0  }
   0x2   :  { %v262_v3 = vpack.c.bf16 %v23_v1, %v22_v0  ;;  %251 = vmatprep.mubr.msk.f32.mxu0 %vm302_vm3, %v303_v5  ;;  %v120_v6 = vld [vmem:[%s391_s3] sm:$0xff]  ;;  %v121_v7 = vld [vmem:[%s391_s3 + $0x8] sm:$0x3]  ;;  %vm271_vm4 = vmpackc.low %vm129_vm2, %vm129_vm2  ;;  %258 = vmatprep.mubr.msk.f32.mxu1 %vm302_vm3, %v303_v5 }
   0x3   :  { %v270_v8 = vpack.c.bf16 %v121_v7, %v120_v6 }
   0x4   :  { %264 = vmatpush3.bf16.xpose.msk.msra.mxu0 %vm343_vm1, %v262_v3 }
   0x5   :  { %10 = vsyncpa [#allocation3], 0  ;;  %265 = vmatprep.subr.bf16.mxu0 %v301_v2  ;;  %v24_v9 = vld [vmem:[%s389_s1 + $0x10] sm:$0xff]  ;;  %v25_v10 = vld [vmem:[%s389_s1 + $0x18] sm:$0xff]  ;;  %272 = vmatpush3.bf16.xpose.msk.msra.mxu1 %vm271_vm4, %v270_v8  ;;  %s304_s9 = smov [#allocation2]   ;;  %vm209_vm5 = vcmask 80896  }
   0x6   :  { %v266_v11 = vpack.c.bf16 %v25_v10, %v24_v9  ;;  %v21_v12 = vld [vmem:[%s388_s0] sm:$0xff]  ;;  %s217_s10 = sshll.u32 %s304_s9, 4  ;;  %s218_s10 = int_to_ptr.vmem [resolvable:$true] %s217_s10 }
   0x7   :  { %v225_v13 = vld [vmem:[%s390_s2] ss:$0 sm:$0xff]  ;;  %s277_s0 = scalar_lea.vmem %s218_s10, 128  ;;  %p282_p1 = scmp.lt.s32.totalorder %s218_s10, %s218_s10 }
   0x8   :  { %v231_v18 = vld [vmem:[%s392_s4] ss:$0 sm:$0xff]  ;;  %p278_p0 = scmp.ne.s32.totalorder %s218_s10, %s277_s0  ;;  %p283_p2 = scmp.lt.s32.totalorder %s277_s0, %s277_s0 }
   0xa   :  { %p284_p3 = por %p283_p2, %p282_p1 }
   0xc   :  { %268 = vmatpush3.bf16.xpose.msk.msra.mxu0 %vm343_vm1, %v266_v11  ;;  %p285_p4 = pnand %p284_p3, %p278_p0 }
  0x13   :  { %252 = vmatmul.mubr.msk.f32.vlgmr.msra.gmra.mrb[0].mxu0 %vm33_vm0, %v21_v12 }
  0xe6   :  { %v115_v14 = vpop.f32.mrb[0].mxu0 }
  0xe7   :  { %v116_v15 = vadd.f32 %v225_v13, %v115_v14  ;;  %v253_v16 = vpop.f32.mrb[1].mxu0 }
  0xe9   :  { %v119_v17 = vmax.f32 %v116_v15, 0.0 }
  0xeb   :  { %259 = vmatmul.mubr.msk.f32.vlgmr.msra.gmra.mrb[0].mxu1 %vm129_vm2, %v119_v17 }
 0x1be   :  { %v205_v19 = vpop.f32.mrb[0].mxu1 }
 0x1bf   :  { %v206_v20 = vadd.f32 %v231_v18, %v205_v19  ;;  %v260_v21 = vpop.f32.mrb[1].mxu1 }
 0x1c1   :  { %210 = vst.msk [vmem:[#allocation2] sm:$0xff] %vm209_vm5, %v206_v20 }
 0x1c2   :  { %288 = shalt.err (!%p285_p4)
}
 0x1c3   :  { %s289_s12 = scalar_lea.hbm %s393_s5, 128 }
 0x1c4   :  { %p290_p5 = scmp.ne.s32.totalorder %s393_s5, %s289_s12  ;;  %p293_p6 = scmp.lt.u32.totalorder %s289_s12, %s393_s5 }
 0x1c6   :  { %p295_p7 = pnand %p293_p6, %p290_p5 }
 0x1c8   :  { %298 = shalt.err (!%p295_p7)
}
 0x1c9   :  { %220 = dma.vmem_to_hbm [thread:$0]  %s218_s10, 128, %s393_s5, [#allocation3]  }
 0x1ca   :  { %299 = dma.done.wait [#allocation3], 128  }
 0x1cb   :  { %300 = vsyncadd [#allocation3], 4294967168 }
 0x1cc   :  { %224 = vsyncpa [#allocation3], 1 }

</bundles_post_ra>
